<compile_context>
chip_gen: v5e
topology: v5e:2x2
jax: 0.10.0
libtpu: 0.0.40
codegen_flags: <defaults>
</compile_context>

<pallas_src>
import jax
import jax.numpy as jnp
from jax.experimental import pallas as pl
from jax.experimental.pallas import tpu as pltpu

LANE = 128      # lane width (last dim)
SUBLANE = 8     # f32 sublane width (second-to-last dim)


def _round_up(x, m):
    return ((x + m - 1) // m) * m


def _vmem_limit_bytes():
    """VMEM budget with ~20% headroom for compiler scratch / output buffers."""
    try:
        info = pltpu.get_tpu_info()
        cap = getattr(info, "vmem_capacity_bytes", None)
        if cap:
            return int(cap) * 4 // 5      # ~52 MiB on v7x, ~104 MiB on v5e/v6e
    except Exception:
        pass
    return 48 * 1024 * 1024               # conservative fallback, fits all gens


def mlp_kernel(x_ref, w1_ref, b1_ref, w2_ref, b2_ref, o_ref, h_ref):
    """out[i, j] = relu(x[i] @ W1 + b1) @ W2[:, j] + b2[j].

    Grid = (batch_tiles, n_tiles).  The hidden activation for the current
    batch tile is computed once (at the first N tile) into the VMEM scratch
    `h_ref` and reused across all N tiles of that batch tile.
    """
    nj = pl.program_id(1)

    @pl.when(nj == 0)
    def _():
        # (TB, Din_p) @ (Din_p, Dout_p), f32 accumulation on the MXU, fused
        # f32 bias + ReLU epilogue, staged to VMEM in the compute dtype.
        h = jnp.dot(x_ref[...], w1_ref[...], preferred_element_type=jnp.float32)
        h = jnp.maximum(h + b1_ref[...], 0.0)
        h_ref[...] = h.astype(h_ref.dtype)

    # (TB, Dout_p) @ (Dout_p, tn), f32 accumulation, f32 bias epilogue,
    # lane-dense store (tn is a multiple of 128).
    out = jnp.dot(h_ref[...], w2_ref[...], preferred_element_type=jnp.float32)
    o_ref[...] = (out + b2_ref[...]).astype(o_ref.dtype)


def prepare_params(w1, b1, w2, b2, *, block_n=None, compute_dtype=jnp.bfloat16):
    """Pad / cast the weights ONCE (hoisted out of the per-call forward path).

    w1 : (Din, Dout)   -- transposed vs. PyTorch nn.Linear weight layout
    b1 : (Dout,)
    w2 : (Dout, Dout)  -- transposed vs. PyTorch nn.Linear weight layout
    b2 : (Dout,)
    block_n : N (Dout) tile width; multiples of 256 preferred on v6e/v7x
              (256x256 MXU), 128 on v5e.
    compute_dtype : matmul operand dtype (bf16 default; accumulation is f32).
    """
    Din, Dout = w1.shape
    assert b1.shape == (Dout,) and w2.shape == (Dout, Dout) and b2.shape == (Dout,)

    Dout_lane = _round_up(Dout, LANE)
    if block_n is None:
        block_n = 256 if Dout_lane >= 256 else LANE
    tn = min(_round_up(block_n, LANE), Dout_lane)
    Dout_p = _round_up(Dout_lane, tn)
    Din_p = _round_up(Din, LANE)

    # Zero padding keeps the math exact: padded W1 columns give h = relu(0)=0,
    # padded W2 rows contribute nothing, padded output columns are sliced off.
    w1_p = jnp.pad(w1, ((0, Din_p - Din), (0, Dout_p - Dout))).astype(compute_dtype)
    w2_p = jnp.pad(w2, ((0, Dout_p - Dout), (0, Dout_p - Dout))).astype(compute_dtype)
    b1_p = jnp.pad(b1, (0, Dout_p - Dout)).reshape(1, Dout_p).astype(jnp.float32)
    b2_p = jnp.pad(b2, (0, Dout_p - Dout)).reshape(1, Dout_p).astype(jnp.float32)

    return dict(w1=w1_p, b1=b1_p, w2=w2_p, b2=b2_p,
                Din=Din, Dout=Dout, Din_p=Din_p, Dout_p=Dout_p, tn=tn,
                compute_dtype=compute_dtype)


def linear_model_forward(x, params, *, block_batch=None):
    """Pallas forward pass of LinearModel: relu(x @ W1 + b1) @ W2 + b2."""
    B, Din = x.shape
    assert Din == params["Din"], (Din, params["Din"])
    Din_p = params["Din_p"]
    Dout = params["Dout"]
    Dout_p = params["Dout_p"]
    tn = params["tn"]
    compute_dtype = params["compute_dtype"]
    out_dtype = x.dtype

    # Batch tile: rounded to a sublane multiple (8,128 rule).  Large tiles
    # amortize the ~0.35 us per-grid-step overhead but are capped so the h
    # intermediate stays a modest VMEM scratch rather than a vreg blowout.
    if block_batch is None:
        block_batch = 256
    TB = min(_round_up(block_batch, SUBLANE), _round_up(B, SUBLANE))
    B_p = _round_up(B, TB)

    x_p = jnp.pad(x, ((0, B_p - B), (0, Din_p - Din))).astype(compute_dtype)

    grid = (B_p // TB, Dout_p // tn)

    op_bytes = jnp.dtype(compute_dtype).itemsize
    cost = pl.CostEstimate(
        flops=2 * B_p * Dout_p * (Din_p + Dout_p),
        transcendentals=0,
        bytes_accessed=(B_p * Din_p + Din_p * Dout_p + Dout_p * Dout_p) * op_bytes
        + 2 * Dout_p * 4
        + B_p * Dout_p * jnp.dtype(out_dtype).itemsize,
    )

    # TODO(synk): for very large Din (when the (Din_p, Dout_p) W1 block no
    # longer fits VMEM), add a K-reduction grid axis over Din with an f32 VMEM
    # accumulator (pl.when init at k==0, bias+ReLU finalize at k==last),
    # placed last in the grid and marked "arbitrary".
    out_p = pl.pallas_call(
        mlp_kernel,
        out_shape=jax.ShapeDtypeStruct((B_p, Dout_p), out_dtype),
        grid=grid,
        in_specs=[
            # Activations: blocked along batch; constant across the N axis so
            # they are DMA'd only once per batch tile.
            pl.BlockSpec((TB, Din_p), lambda i, j: (i, 0)),
            # W1 / b1 are weight-stationary (constant index_map) -> single
            # buffer: no point double-buffering something never re-fetched.
            pl.BlockSpec((Din_p, Dout_p), lambda i, j: (0, 0),
                         pipeline_mode=pl.Buffered(1)),
            pl.BlockSpec((1, Dout_p), lambda i, j: (0, 0),
                         pipeline_mode=pl.Buffered(1)),
            # W2 / b2 stream one lane-dense N tile per grid step (pipelined).
            pl.BlockSpec((Dout_p, tn), lambda i, j: (0, j)),
            pl.BlockSpec((1, tn), lambda i, j: (0, j)),
        ],
        out_specs=pl.BlockSpec((TB, tn), lambda i, j: (i, j)),
        scratch_shapes=[pltpu.VMEM((TB, Dout_p), compute_dtype)],
        compiler_params=pltpu.CompilerParams(
            # Batch tiles are independent -> "parallel" (megacore sharding);
            # the N axis carries the h-scratch dependency -> "arbitrary".
            # NOTE(v7x): "parallel" batch replicates the stationary W1 buffer
            # in each TC's private VMEM; if that ever binds, flip the batch
            # axis to "arbitrary".
            dimension_semantics=("parallel", "arbitrary"),
            vmem_limit_bytes=_vmem_limit_bytes(),
        ),
        cost_estimate=cost,
    )(x_p, params["w1"], params["b1"], params["w2"], params["b2"])

    # Slice padded batch rows / output lanes back to the logical shape.
    return out_p[:B, :Dout]


def linear_model_apply(x, w1, b1, w2, b2, *, compute_dtype=jnp.bfloat16,
                       block_batch=None, block_n=None):
    """Convenience one-shot API (prepare + forward)."""
    params = prepare_params(w1, b1, w2, b2, block_n=block_n,
                            compute_dtype=compute_dtype)
    return linear_model_forward(x, params, block_batch=block_batch)


def reference_forward(x, w1, b1, w2, b2):
    h = jnp.maximum(x @ w1 + b1, 0.0)
    return h @ w2 + b2


if __name__ == "__main__":
    key = jax.random.PRNGKey(0)
    k_x, k_w1, k_b1, k_w2, k_b2 = jax.random.split(key, 5)

    batch = 8
    input_dim = 32
    output_dim = 32

    x = jax.random.normal(k_x, (batch, input_dim), dtype=jnp.float32)

    # Deterministic init (uniform in +/- 1/sqrt(fan_in), like torch default).
    bound1 = 1.0 / (input_dim ** 0.5)
    bound2 = 1.0 / (output_dim ** 0.5)
    w1 = jax.random.uniform(k_w1, (input_dim, output_dim),
                            minval=-bound1, maxval=bound1, dtype=jnp.float32)
    b1 = jax.random.uniform(k_b1, (output_dim,),
                            minval=-bound1, maxval=bound1, dtype=jnp.float32)
    w2 = jax.random.uniform(k_w2, (output_dim, output_dim),
                            minval=-bound2, maxval=bound2, dtype=jnp.float32)
    b2 = jax.random.uniform(k_b2, (output_dim,),
                            minval=-bound2, maxval=bound2, dtype=jnp.float32)

    ref = reference_forward(x, w1, b1, w2, b2)

    # --- f32 operand path: padded math is exact -> tight tolerance ----------
    params_f32 = prepare_params(w1, b1, w2, b2, compute_dtype=jnp.float32)
    out_f32 = jax.block_until_ready(linear_model_forward(x, params_f32))
    assert out_f32.shape == (batch, output_dim)
    assert jnp.allclose(out_f32, ref, atol=1e-5, rtol=1e-5), \
        float(jnp.max(jnp.abs(out_f32 - ref)))

    # --- default bf16 operand path (f32 accumulation): looser tolerance -----
    params_bf16 = prepare_params(w1, b1, w2, b2)   # compute_dtype=bf16 default
    out_bf16 = jax.block_until_ready(linear_model_forward(x, params_bf16))
    assert out_bf16.shape == (batch, output_dim)
    assert jnp.allclose(out_bf16, ref, atol=5e-2, rtol=5e-2), \
        float(jnp.max(jnp.abs(out_bf16 - ref)))

    print("KERNEL_OK")
</pallas_src>

<mosaic_0001>
module attributes {stable_mosaic.version = 11 : i64} {
  func.func @mlp_kernel(%arg0: i32, %arg1: i32, %arg2: memref<8x128xf32, #tpu.memory_space<vmem>>, %arg3: memref<128x128xf32, #tpu.memory_space<vmem>>, %arg4: memref<1x128xf32, #tpu.memory_space<vmem>>, %arg5: memref<128x128xf32, #tpu.memory_space<vmem>>, %arg6: memref<1x128xf32, #tpu.memory_space<vmem>>, %arg7: memref<8x128xf32, #tpu.memory_space<vmem>>, %arg8: memref<8x128xf32, #tpu.memory_space<vmem>>) attributes {dimension_semantics = [#tpu.dimension_semantics<parallel>, #tpu.dimension_semantics<arbitrary>], iteration_bounds = array<i64: 1, 1>, scalar_prefetch = 0 : i64, scratch_operands = 1 : i64, tpu.core_type = #tpu.core_type<tc>, window_params = [{transform_indices = @transform_0, window_bounds = array<i64: 8, 128>}, {pipeline_mode = #tpu.pipeline_mode<synchronous>, transform_indices = @transform_1, window_bounds = array<i64: 128, 128>}, {pipeline_mode = #tpu.pipeline_mode<synchronous>, transform_indices = @transform_2, window_bounds = array<i64: 1, 128>}, {transform_indices = @transform_3, window_bounds = array<i64: 128, 128>}, {transform_indices = @transform_4, window_bounds = array<i64: 1, 128>}, {transform_indices = @transform_5, window_bounds = array<i64: 8, 128>}]} {
    %c0_i32 = arith.constant 0 : i32
    %0 = arith.cmpi eq, %arg1, %c0_i32 : i32
    %1 = arith.extui %0 : i1 to i32
    %c0_i32_0 = arith.constant 0 : i32
    %2 = arith.cmpi ne, %1, %c0_i32_0 : i32
    scf.if %2 {
      %c0_8 = arith.constant 0 : index
      %c0_9 = arith.constant 0 : index
      %10 = vector.load %arg2[%c0_8, %c0_9] : memref<8x128xf32, #tpu.memory_space<vmem>>, vector<8x128xf32>
      %c0_10 = arith.constant 0 : index
      %c0_11 = arith.constant 0 : index
      %11 = vector.load %arg3[%c0_10, %c0_11] : memref<128x128xf32, #tpu.memory_space<vmem>>, vector<128x128xf32>
      %cst_12 = arith.constant dense<0.000000e+00> : vector<8x128xf32>
      %12 = tpu.matmul %10, %11, %cst_12 {dimension_numbers = #tpu.dot_dimension_numbers<[1], [0], [0], [1], [0, 0, 1, 1], [], []>} : vector<8x128xf32>, vector<128x128xf32>, vector<8x128xf32> -> vector<8x128xf32>
      %c0_13 = arith.constant 0 : index
      %c0_14 = arith.constant 0 : index
      %13 = vector.load %arg4[%c0_13, %c0_14] : memref<1x128xf32, #tpu.memory_space<vmem>>, vector<1x128xf32>
      %14 = vector.broadcast %13 : vector<1x128xf32> to vector<8x128xf32>
      %15 = arith.addf %12, %14 : vector<8x128xf32>
      %cst_15 = arith.constant 0.000000e+00 : f32
      %16 = vector.broadcast %cst_15 : f32 to vector<8x128xf32>
      %17 = arith.maximumf %15, %16 : vector<8x128xf32>
      %c0_16 = arith.constant 0 : index
      %c0_17 = arith.constant 0 : index
      %18 = vector.load %arg8[%c0_16, %c0_17] : memref<8x128xf32, #tpu.memory_space<vmem>>, vector<8x128xf32>
      tpu.vector_store %arg8[%c0_16, %c0_17], %17 {strides = array<i32>} : memref<8x128xf32, #tpu.memory_space<vmem>>, vector<8x128xf32>,
    } else {
    }
    %c0 = arith.constant 0 : index
    %c0_1 = arith.constant 0 : index
    %3 = vector.load %arg8[%c0, %c0_1] : memref<8x128xf32, #tpu.memory_space<vmem>>, vector<8x128xf32>
    %c0_2 = arith.constant 0 : index
    %c0_3 = arith.constant 0 : index
    %4 = vector.load %arg5[%c0_2, %c0_3] : memref<128x128xf32, #tpu.memory_space<vmem>>, vector<128x128xf32>
    %cst = arith.constant dense<0.000000e+00> : vector<8x128xf32>
    %5 = tpu.matmul %3, %4, %cst {dimension_numbers = #tpu.dot_dimension_numbers<[1], [0], [0], [1], [0, 0, 1, 1], [], []>} : vector<8x128xf32>, vector<128x128xf32>, vector<8x128xf32> -> vector<8x128xf32>
    %c0_4 = arith.constant 0 : index
    %c0_5 = arith.constant 0 : index
    %6 = vector.load %arg6[%c0_4, %c0_5] : memref<1x128xf32, #tpu.memory_space<vmem>>, vector<1x128xf32>
    %7 = vector.broadcast %6 : vector<1x128xf32> to vector<8x128xf32>
    %8 = arith.addf %5, %7 : vector<8x128xf32>
    %c0_6 = arith.constant 0 : index
    %c0_7 = arith.constant 0 : index
    %9 = vector.load %arg7[%c0_6, %c0_7] : memref<8x128xf32, #tpu.memory_space<vmem>>, vector<8x128xf32>
    tpu.vector_store %arg7[%c0_6, %c0_7], %8 {strides = array<i32>} : memref<8x128xf32, #tpu.memory_space<vmem>>, vector<8x128xf32>,
    return
  }
  func.func @transform_0(%arg0: i32, %arg1: i32) -> (i32, i32) {
    %c0_i32 = arith.constant 0 : i32
    %c0_i32_0 = arith.constant 0 : i32
    return %arg0, %c0_i32 : i32, i32
  }
  func.func @transform_1(%arg0: i32, %arg1: i32) -> (i32, i32) {
    %c0_i32 = arith.constant 0 : i32
    %c0_i32_0 = arith.constant 0 : i32
    %c0_i32_1 = arith.constant 0 : i32
    return %c0_i32, %c0_i32_0 : i32, i32
  }
  func.func @transform_2(%arg0: i32, %arg1: i32) -> (i32, i32) {
    %c0_i32 = arith.constant 0 : i32
    %c0_i32_0 = arith.constant 0 : i32
    %c0_i32_1 = arith.constant 0 : i32
    return %c0_i32, %c0_i32_0 : i32, i32
  }
  func.func @transform_3(%arg0: i32, %arg1: i32) -> (i32, i32) {
    %c0_i32 = arith.constant 0 : i32
    %c0_i32_0 = arith.constant 0 : i32
    return %c0_i32, %arg1 : i32, i32
  }
  func.func @transform_4(%arg0: i32, %arg1: i32) -> (i32, i32) {
    %c0_i32 = arith.constant 0 : i32
    %c0_i32_0 = arith.constant 0 : i32
    return %c0_i32, %arg1 : i32, i32
  }
  func.func @transform_5(%arg0: i32, %arg1: i32) -> (i32, i32) {
    %c0_i32 = arith.constant 0 : i32
    return %arg0, %arg1 : i32, i32
  }
}

</mosaic_0001>

<bundles_post_ra>
// kernel: tpu_custom_call.1
= control target key start
LH: loop header
LB: loop body
LE: loop exit
PB: predicated region body
PF: predicated region fallthrough
CT: control target
= control target key end

     0   :  { %10 = vsyncpa [#allocation4], 0  ;;  %s337_s0 = inlined_call_operand.hbm [shape: f32[8,128], index: 0, kind: input, shape index: {}]   ;;  %s338_s1 = inlined_call_operand.hbm [shape: f32[128,128], index: 1, kind: input, shape index: {}]   ;;  %s339_s2 = inlined_call_operand.vmem [shape: f32[1,128], index: 2, kind: input, shape index: {}]   ;;  %s340_s3 = inlined_call_operand.hbm [shape: f32[128,128], index: 3, kind: input, shape index: {}]   ;;  %s341_s4 = inlined_call_operand.vmem [shape: f32[1,128], index: 4, kind: input, shape index: {}]   ;;  %s342_s5 = inlined_call_operand.hbm [shape: f32[8,128], index: 5, kind: output, shape index: {}]  }
   0x1   :  { %11 = vsyncpa [#allocation7], 0  ;;  %s28_s20 = sshll.u32 %s338_s1, 4  ;;  %s29_s20 = int_to_ptr.hbm [resolvable:$true] %s28_s20 }
   0x2   :  { %12 = vsyncpa [#allocation5], 0  ;;  %s283_s21 = smov [#allocation6]   ;;  %s18_s25 = sshll.u32 %s337_s0, 4  ;;  %s19_s25 = int_to_ptr.hbm [resolvable:$true] %s18_s25 }
   0x3   :  { %s30_s22 = sshll.u32 %s283_s21, 4  ;;  %s284_s26 = smov 128   ;;  %s31_s22 = int_to_ptr.vmem [resolvable:$true] %s30_s22 }
   0x4   :  { %s285_s27 = smov 8   ;;  %s286_s28 = smov [#allocation3]  }
   0x5   :  { %36 = dma.hbm_to_vmem [thread:$0]  %s29_s20, 2048, %s31_s22, [#allocation7], %s284_s26, %s284_s26, %s285_s27  }
   0x6   :  { %s20_s29 = sshll.u32 %s286_s28, 4  ;;  %s43_s7 = sshll.u32 %s340_s3, 4  ;;  %s21_s29 = int_to_ptr.vmem [resolvable:$true] %s20_s29  ;;  %s44_s7 = int_to_ptr.hbm [resolvable:$true] %s43_s7 }
   0x7   :  { %23 = dma.hbm_to_vmem [thread:$0]  %s19_s25, 128, %s21_s29, [#allocation4]  }
   0x8   :  { %s287_s1 = smov [#allocation8]  }
   0x9   :  { %s45_s8 = sshll.u32 %s287_s1, 4  ;;  %s46_s8 = int_to_ptr.vmem [resolvable:$true] %s45_s8 }
   0xa   :  { %51 = dma.hbm_to_vmem [thread:$0]  %s44_s7, 2048, %s46_s8, [#allocation7], %s284_s26, %s284_s26, %s285_s27  }
   0xb   :  { %277 = dma.done.wait [#allocation4], 128  }
   0xc   :  { %278 = vsyncadd [#allocation4], 4294967168 }
   0xd   :  { %279 = dma.done.wait [#allocation7], 4096  }
   0xe   :  { %280 = vsyncadd [#allocation7], 4294963200  ;;  %v86_v0 = vld [vmem:[#allocation6 + $0x78] sm:$0xff]  ;;  %v85_v1 = vld [vmem:[#allocation6 + $0x70] sm:$0xff]  ;;  %s288_s11 = smov [#allocation9]   ;;  %s162_s15 = sshll.u32 %s342_s5, 4  ;;  %s163_s15 = int_to_ptr.hbm [resolvable:$true] %s162_s15 }
   0xf   :  { %91 = vmatpush.msra.mxu0 %v86_v0  ;;  %v84_v2 = vld [vmem:[#allocation6 + $0x68] sm:$0xff]  ;;  %v83_v3 = vld [vmem:[#allocation6 + $0x60] sm:$0xff]  ;;  %v129_v4 = vld [vmem:[#allocation8 + $0x78] sm:$0xff]  ;;  %s160_s12 = sshll.u32 %s288_s11, 4  ;;  %s161_s12 = int_to_ptr.vmem [resolvable:$true] %s160_s12 }
  0x10   :  { %v82_v5 = vld [vmem:[#allocation6 + $0x58] sm:$0xff]  ;;  %134 = vmatpush.msra.mxu1 %v129_v4  ;;  %v128_v6 = vld [vmem:[#allocation8 + $0x70] sm:$0xff]  ;;  %v127_v7 = vld [vmem:[#allocation8 + $0x68] sm:$0xff] }
  0x11   :  { %92 = vmatpush.msra.mxu0 %v85_v1  ;;  %v81_v8 = vld [vmem:[#allocation6 + $0x50] sm:$0xff]  ;;  %v126_v9 = vld [vmem:[#allocation8 + $0x60] sm:$0xff]  ;;  %v80_v10 = vld [vmem:[#allocation6 + $0x48] sm:$0xff] }
  0x12   :  { %135 = vmatpush.msra.mxu1 %v128_v6  ;;  %v125_v11 = vld [vmem:[#allocation8 + $0x58] sm:$0xff]  ;;  %v79_v12 = vld [vmem:[#allocation6 + $0x40] sm:$0xff]  ;;  %v124_v13 = vld [vmem:[#allocation8 + $0x50] sm:$0xff] }
  0x13   :  { %93 = vmatpush.msra.mxu0 %v84_v2  ;;  %v78_v14 = vld [vmem:[#allocation6 + $0x38] sm:$0xff]  ;;  %v123_v15 = vld [vmem:[#allocation8 + $0x48] sm:$0xff]  ;;  %v77_v16 = vld [vmem:[#allocation6 + $0x30] sm:$0xff] }
  0x14   :  { %136 = vmatpush.msra.mxu1 %v127_v7  ;;  %v122_v17 = vld [vmem:[#allocation8 + $0x40] sm:$0xff]  ;;  %v76_v18 = vld [vmem:[#allocation6 + $0x28] sm:$0xff]  ;;  %v121_v19 = vld [vmem:[#allocation8 + $0x38] sm:$0xff] }
  0x15   :  { %94 = vmatpush.msra.mxu0 %v83_v3  ;;  %v75_v20 = vld [vmem:[#allocation6 + $0x20] sm:$0xff]  ;;  %v120_v21 = vld [vmem:[#allocation8 + $0x30] sm:$0xff]  ;;  %v74_v22 = vld [vmem:[#allocation6 + $0x18] sm:$0xff] }
  0x16   :  { %137 = vmatpush.msra.mxu1 %v126_v9  ;;  %v119_v23 = vld [vmem:[#allocation8 + $0x28] sm:$0xff]  ;;  %v73_v24 = vld [vmem:[#allocation6 + $0x10] sm:$0xff]  ;;  %v118_v25 = vld [vmem:[#allocation8 + $0x20] sm:$0xff] }
  0x17   :  { %95 = vmatpush.msra.mxu0 %v82_v5  ;;  %v72_v26 = vld [vmem:[#allocation6 + $0x8] sm:$0xff]  ;;  %v117_v27 = vld [vmem:[#allocation8 + $0x18] sm:$0xff]  ;;  %v71_v28 = vld [vmem:[#allocation6] sm:$0xff] }
  0x18   :  { %138 = vmatpush.msra.mxu1 %v125_v11  ;;  %v70_v29 = vld [vmem:[#allocation3] sm:$0xff]  ;;  %v116_v30 = vld [vmem:[#allocation8 + $0x10] sm:$0xff]  ;;  %v115_v31 = vld [vmem:[#allocation8 + $0x8] sm:$0xff] }
  0x19   :  { %96 = vmatpush.msra.mxu0 %v81_v8  ;;  %v114_v32 = vld [vmem:[#allocation8] sm:$0xff]  ;;  %v179_v33 = vld [vmem:[%s339_s2] ss:$0 sm:$0xff] }
  0x1a   :  { %139 = vmatpush.msra.mxu1 %v124_v13  ;;  %v180_v37 = vld [vmem:[%s341_s4] ss:$0 sm:$0xff] }
  0x1b   :  { %97 = vmatpush.msra.mxu0 %v80_v10 }
  0x1c   :  { %140 = vmatpush.msra.mxu1 %v123_v15 }
  0x1d   :  { %98 = vmatpush.msra.mxu0 %v79_v12 }
  0x1e   :  { %141 = vmatpush.msra.mxu1 %v122_v17 }
  0x1f   :  { %99 = vmatpush.msra.mxu0 %v78_v14 }
  0x20   :  { %142 = vmatpush.msra.mxu1 %v121_v19 }
  0x21   :  { %100 = vmatpush.msra.mxu0 %v77_v16 }
  0x22   :  { %143 = vmatpush.msra.mxu1 %v120_v21 }
  0x23   :  { %101 = vmatpush.msra.mxu0 %v76_v18 }
  0x24   :  { %144 = vmatpush.msra.mxu1 %v119_v23 }
  0x25   :  { %102 = vmatpush.msra.mxu0 %v75_v20 }
  0x26   :  { %145 = vmatpush.msra.mxu1 %v118_v25 }
  0x27   :  { %103 = vmatpush.msra.mxu0 %v74_v22 }
  0x28   :  { %146 = vmatpush.msra.mxu1 %v117_v27 }
  0x29   :  { %104 = vmatpush.msra.mxu0 %v73_v24 }
  0x2a   :  { %147 = vmatpush.msra.mxu1 %v116_v30 }
  0x2b   :  { %105 = vmatpush.msra.mxu0 %v72_v26 }
  0x2c   :  { %148 = vmatpush.msra.mxu1 %v115_v31 }
  0x2d   :  { %106 = vmatpush.msra.mxu0 %v71_v28 }
  0x2e   :  { %107 = vmatmul.f32.vlgmr.msra.gmra.mxu0 %v70_v29  ;;  %149 = vmatpush.msra.mxu1 %v114_v32 }
  0xab   :  { %v108_v34 = vpop.f32.mrf.mxu0 }
  0xac   :  { %v109_v35 = vadd.f32 %v179_v33, %v108_v34 }
  0xae   :  { %v111_v36 = vmax.f32 %v109_v35, 0.0 }
  0xb0   :  { %150 = vmatmul.f32.vlgmr.msra.gmra.mxu1 %v111_v36 }
 0x12d   :  { %v151_v38 = vpop.f32.mrf.mxu1 }
 0x12e   :  { %v152_v39 = vadd.f32 %v180_v37, %v151_v38 }
 0x130   :  { %154 = vst [vmem:[#allocation9] sm:$0xff] %v152_v39 }
 0x131   :  { %165 = dma.vmem_to_hbm [thread:$0]  %s161_s12, 128, %s163_s15, [#allocation5]  }
 0x132   :  { %281 = dma.done.wait [#allocation5], 128  }
 0x133   :  { %282 = vsyncadd [#allocation5], 4294967168 }
 0x134   :  { %170 = vsyncpa [#allocation4], 1 }
 0x135   :  { %171 = vsyncpa [#allocation7], 1 }
 0x136   :  { %172 = vsyncpa [#allocation5], 1 }

</bundles_post_ra>
